<compile_context>
chip_gen: v6e
topology: v6e:2x2x1
jax: 0.10.0
libtpu: 0.0.40
codegen_flags: <defaults>
</compile_context>

<pallas_src>
import jax
import jax.numpy as jnp
from jax.experimental import pallas as pl
from jax.experimental.pallas import tpu as pltpu


def _pad_to(v, m):
    return -(-v // m) * m


def _make_laplace_kernel(d, h, w):
    hw = h * w
    di = d - 2  # interior depth

    def kernel(x_ref, o_ref):
        # x_ref block: (TN, D, H*W)   o_ref block: (TN, D-2, H*W)
        xc = x_ref[:, pl.ds(1, di), :].astype(jnp.float32)          # center d
        acc = x_ref[:, pl.ds(0, di), :].astype(jnp.float32)         # d-1
        acc = acc + x_ref[:, pl.ds(2, di), :].astype(jnp.float32)   # d+1
        acc = acc - 6.0 * xc
        # H/W neighbors via lane rotations (XLU).  Wrap-around only pollutes
        # the h/w halo columns, which the wrapper slices away.
        acc = acc + pltpu.roll(xc, 1, 2)         # w-1
        acc = acc + pltpu.roll(xc, hw - 1, 2)    # w+1
        acc = acc + pltpu.roll(xc, w, 2)         # h-1
        acc = acc + pltpu.roll(xc, hw - w, 2)    # h+1
        o_ref[...] = acc.astype(o_ref.dtype)

    return kernel


def laplace3d(x):
    """x: (N, 1, D, H, W) -> (N, 1, D-2, H-2, W-2)  ==  Laplace3d()(x)."""
    n, c, d, h, w = x.shape
    assert c == 1, "Laplace3d filter has a single input channel"
    assert d > 2 and h > 2 and w > 2, "valid 3x3x3 conv needs D,H,W > 2"

    hw = h * w
    itemsize = jnp.dtype(x.dtype).itemsize
    x3 = x.reshape(n, d, hw)                    # free: collapses minor dims

    # ---- per-batch-item VMEM footprint (with (8,128) tile padding) ----
    hw_pad = _pad_to(hw, 128)
    in_item = _pad_to(d, 8) * hw_pad * itemsize
    out_item = _pad_to(d - 2, 8) * hw_pad * itemsize
    f32_item = _pad_to(d - 2, 8) * hw_pad * 4
    # double-buffered input + output, ~4 live f32 temporaries in the body
    per_item = 2 * in_item + 2 * out_item + 4 * f32_item

    budget = 24 << 20                           # safe on v5e / v6e / v7x
    tn_cap = max(1, budget // per_item)

    # Keep the pipeline busy: >=4 steps for big inputs, >=2 otherwise (v7x TCs).
    total_in_bytes = n * d * hw * itemsize
    if total_in_bytes > (2 << 20):
        tn_cap = min(tn_cap, max(1, n // 4))
    else:
        tn_cap = min(tn_cap, max(1, -(-n // 2)))

    # Largest divisor of n within the cap -> exact grid, no batch padding copy.
    tn = 1
    for cand in range(min(tn_cap, n), 0, -1):
        if n % cand == 0:
            tn = cand
            break
    grid = (n // tn,)

    need = tn * per_item
    vmem_limit = int(min(64 << 20, max(32 << 20, need * 5 // 4)))

    out_elems = n * (d - 2) * (h - 2) * (w - 2)
    cost = pl.CostEstimate(
        flops=7 * out_elems,
        transcendentals=0,
        bytes_accessed=(n * d * hw + n * (d - 2) * hw) * itemsize,
    )

    out3 = pl.pallas_call(
        _make_laplace_kernel(d, h, w),
        out_shape=jax.ShapeDtypeStruct((n, d - 2, hw), x.dtype),
        grid=grid,
        in_specs=[pl.BlockSpec((tn, d, hw), lambda i: (i, 0, 0))],
        out_specs=pl.BlockSpec((tn, d - 2, hw), lambda i: (i, 0, 0)),
        compiler_params=pltpu.CompilerParams(
            dimension_semantics=("parallel",),
            vmem_limit_bytes=vmem_limit),
        cost_estimate=cost,
    )(x3)

    # Trim the H/W halo columns (kernel stores full-width lane-dense rows).
    out = out3.reshape(n, d - 2, h, w)[:, :, 1:-1, 1:-1]
    return out[:, None]                         # (N, 1, D-2, H-2, W-2)


def _laplace3d_filter():
    l = jnp.zeros((3, 3, 3), jnp.float32)
    l = l.at[1, 1, 1].set(-6.0)
    l = l.at[1, 1, 2].set(1.0).at[1, 1, 0].set(1.0)
    l = l.at[1, 0, 1].set(1.0).at[1, 2, 1].set(1.0)
    l = l.at[0, 1, 1].set(1.0).at[2, 1, 1].set(1.0)
    return l[None, None]                        # (O=1, I=1, 3, 3, 3)


def _reference(x):
    # Independent reference: XLA conv (cross-correlation, same as F.conv3d).
    return jax.lax.conv_general_dilated(
        x.astype(jnp.float32), _laplace3d_filter(),
        window_strides=(1, 1, 1), padding="VALID",
        dimension_numbers=("NCDHW", "OIDHW", "NCDHW"))


if __name__ == "__main__":
    key = jax.random.PRNGKey(0)
    n, d, h, w = 2, 8, 16, 16                   # x: (N, 1, D, H, W)
    x = jax.random.normal(key, (n, 1, d, h, w), dtype=jnp.float32)

    out = laplace3d(x)
    jax.block_until_ready(out)

    ref = _reference(x)
    assert out.shape == (n, 1, d - 2, h - 2, w - 2), out.shape
    assert jnp.allclose(out, ref, rtol=1e-5, atol=1e-5), (
        float(jnp.max(jnp.abs(out - ref))))
    print("KERNEL_OK")
</pallas_src>

<mosaic_0001>
module attributes {stable_mosaic.version = 11 : i64} {
  func.func @kernel(%arg0: i32, %arg1: memref<1x8x256xf32, #tpu.memory_space<vmem>>, %arg2: memref<1x6x256xf32, #tpu.memory_space<vmem>>) attributes {dimension_semantics = [#tpu.dimension_semantics<parallel>], iteration_bounds = array<i64: 2>, scalar_prefetch = 0 : i64, scratch_operands = 0 : i64, tpu.core_type = #tpu.core_type<tc>, window_params = [{transform_indices = @transform_0, window_bounds = array<i64: 1, 8, 256>}, {transform_indices = @transform_1, window_bounds = array<i64: 1, 6, 256>}]} {
    %c0 = arith.constant 0 : index
    %c1 = arith.constant 1 : index
    %c0_0 = arith.constant 0 : index
    %0 = vector.load %arg1[%c0, %c1, %c0_0] : memref<1x8x256xf32, #tpu.memory_space<vmem>>, vector<1x6x256xf32>
    %c0_1 = arith.constant 0 : index
    %c0_2 = arith.constant 0 : index
    %c0_3 = arith.constant 0 : index
    %1 = vector.load %arg1[%c0_1, %c0_2, %c0_3] : memref<1x8x256xf32, #tpu.memory_space<vmem>>, vector<1x6x256xf32>
    %c0_4 = arith.constant 0 : index
    %c2 = arith.constant 2 : index
    %c0_5 = arith.constant 0 : index
    %2 = vector.load %arg1[%c0_4, %c2, %c0_5] : memref<1x8x256xf32, #tpu.memory_space<vmem>>, vector<1x6x256xf32>
    %3 = arith.addf %1, %2 : vector<1x6x256xf32>
    %cst = arith.constant 6.000000e+00 : f32
    %4 = vector.broadcast %cst : f32 to vector<1x6x256xf32>
    %5 = arith.mulf %4, %0 : vector<1x6x256xf32>
    %6 = arith.subf %3, %5 : vector<1x6x256xf32>
    %c1_i32 = arith.constant 1 : i32
    %7 = tpu.dynamic_rotate %0 by %c1_i32 dim 2 : vector<1x6x256xf32>, i32 -> vector<1x6x256xf32>
    %8 = arith.addf %6, %7 : vector<1x6x256xf32>
    %c255_i32 = arith.constant 255 : i32
    %9 = tpu.dynamic_rotate %0 by %c255_i32 dim 2 : vector<1x6x256xf32>, i32 -> vector<1x6x256xf32>
    %10 = arith.addf %8, %9 : vector<1x6x256xf32>
    %c16_i32 = arith.constant 16 : i32
    %11 = tpu.dynamic_rotate %0 by %c16_i32 dim 2 : vector<1x6x256xf32>, i32 -> vector<1x6x256xf32>
    %12 = arith.addf %10, %11 : vector<1x6x256xf32>
    %c240_i32 = arith.constant 240 : i32
    %13 = tpu.dynamic_rotate %0 by %c240_i32 dim 2 : vector<1x6x256xf32>, i32 -> vector<1x6x256xf32>
    %14 = arith.addf %12, %13 : vector<1x6x256xf32>
    %c0_6 = arith.constant 0 : index
    %c0_7 = arith.constant 0 : index
    %c0_8 = arith.constant 0 : index
    %15 = vector.load %arg2[%c0_6, %c0_7, %c0_8] : memref<1x6x256xf32, #tpu.memory_space<vmem>>, vector<1x6x256xf32>
    tpu.vector_store %arg2[%c0_6, %c0_7, %c0_8], %14 {strides = array<i32>} : memref<1x6x256xf32, #tpu.memory_space<vmem>>, vector<1x6x256xf32>,
    return
  }
  func.func @transform_0(%arg0: i32) -> (i32, i32, i32) {
    %c0_i32 = arith.constant 0 : i32
    %c0_i32_0 = arith.constant 0 : i32
    %c0_i32_1 = arith.constant 0 : i32
    return %arg0, %c0_i32, %c0_i32_0 : i32, i32, i32
  }
  func.func @transform_1(%arg0: i32) -> (i32, i32, i32) {
    %c0_i32 = arith.constant 0 : i32
    %c0_i32_0 = arith.constant 0 : i32
    %c0_i32_1 = arith.constant 0 : i32
    return %arg0, %c0_i32, %c0_i32_0 : i32, i32, i32
  }
}

</mosaic_0001>

<bundles_post_ra>
// kernel: tpu_custom_call.1
= control target key start
LH: loop header
LB: loop body
LE: loop exit
PB: predicated region body
PF: predicated region fallthrough
CT: control target
= control target key end

     0   :  { %6 = vsyncpa [#allocation3], 0  ;;  %s508_s0 = inlined_call_operand.hbm [shape: f32[2,8,256], index: 0, kind: input, shape index: {}]   ;;  %s509_s1 = inlined_call_operand.vmem [shape: f32[2,6,256], index: 1, kind: output, shape index: {}]  }
   0x1   :  { %8 = vsyncpa [#allocation3 + $0x1], 0  ;;  %s408_s6 = smov 0   ;;  %s410_s7 = smov 0  }
   0x2   :  { %s412_s8 = smov 0   ;;  %s414_s9 = smov 0  }
   0x3 LB: > { %s427_s10 = sadd.s32 4294967295, %s391_s9   ;;  %s430_s11 = sadd.s32 1, %s391_s9   ;;  %s391_s9 = sphi %s414_s9, %s519_s9   ;;  %s387_s8 = sphi %s412_s8, %s518_s8   ;;  %s383_s7 = sphi %s410_s7, %s517_s7   ;;  %s379_s6 = sphi %s408_s6, %s516_s6  }
   0x4   : > { %s18_s12 = ssub.s32 %s391_s9, %s430_s11  ;;  %s21_s13 = sadd.s32 1, %s387_s8 }
   0x5   : > { %p19_p0 = scmp.eq.s32.totalorder %s18_s12, 0  ;;  %p28_p1 = scmp.ne.s32.totalorder %s387_s8, %s383_s7 }
   0x6   : > { %p29_p2 = scmp.eq.s32.totalorder %s391_s9, 0  ;;  %p34_p3 = scmp.ne.s32.totalorder %s383_s7, %s379_s6 }
   0x7   : > { %s440_s14 = scalar_select %p19_p0, %s387_s8, %s21_s13  }
   0x8   : > { %p30_p4 = por %p29_p2, %p28_p1  ;;  %p35_p5 = scmp.eq.s32.totalorder %s427_s10, 0 }
   0x9   : > { %p292_p6 = scmp.lt.s32.totalorder %s391_s9, 2  ;;  %s84_s16 = sand.u32 1, %s387_s8  }
   0xa   : > { %p444_p7 = por %p35_p5, %p34_p3  ;;  %s275_s17 = sshll.u32 %s84_s16, 4 }
   0xb   : > { %s284_s18 = sshll.u32 %s391_s9, 8  ;;  %s88_s22 = scalar_lea.vmem [#allocation2], %s275_s17 }
   0xc   : > { %s511_s15 = scalar_select %p444_p7, 1, 0 }
   0xd   : > { %s453_s21 = scalar_lea.hbm %s508_s0, %s284_s18  ;;  %s96_s23 = sshll.u32 %s88_s22, 4  ;;  %s455_s23 = int_to_ptr.vmem [resolvable:$true] %s96_s23 }
   0xe   : > { %p457_p8 = pnand %p292_p6, %p30_p4  ;;  %s85_s25 = scalar_lea.sflag [#allocation3], %s84_s16 }
   0xf   : > { %s329_s26 = scalar_lea.hbm %s453_s21, 256  ;;  %s334_s29 = scalar_lea.hbm %s508_s0, 512 }
  0x10   : > { %p330_p11 = scmp.ne.s32.totalorder %s453_s21, %s329_s26  ;;  %p331_p12 = pneg %p457_p8 }
  0x11   : > { %p335_p1 = scmp.lt.s32.totalorder %s453_s21, %s508_s0  ;;  %p336_p2 = scmp.lt.s32.totalorder %s334_s29, %s329_s26 }
  0x12   : > { %p332_p13 = pnand %p331_p12, %p330_p11 }
  0x13   : > { %p337_p3 = por %p336_p2, %p335_p1 }
  0x14   : > { %p333_p0 = pneg %p332_p13 }
  0x16   : > { %p338_p4 = pnand %p337_p3, %p333_p0 }
  0x18   : > { %341 = shalt.err (!%p338_p4)
}
  0x19   : > { %s342_s3 = scalar_lea.vmem %s455_s23, 256  ;;  %s393_s4 = smov [#allocation2]  }
  0x1a   : > { %p343_p5 = scmp.ne.s32.totalorder %s455_s23, %s342_s3  ;;  %s347_s5 = sshll.u32 %s393_s4, 4  ;;  %s348_s5 = int_to_ptr.vmem [resolvable:$false] %s347_s5 }
  0x1b   : > { %s349_s6 = scalar_lea.vmem %s348_s5, 512  ;;  %p350_p13 = scmp.lt.s32.totalorder %s455_s23, %s348_s5 }
  0x1c   : > { %p345_p6 = pnand %p343_p5, %p331_p12  ;;  %p351_p9 = scmp.lt.s32.totalorder %s349_s6, %s342_s3 }
  0x1e   : > { %p346_p11 = pneg %p345_p6  ;;  %p352_p10 = por %p351_p9, %p350_p13 }
  0x20   : > { %p353_p7 = pnand %p352_p10, %p346_p11 }
  0x22   : > { %356 = shalt.err (!%p353_p7)
}
  0x23   : > { %291 = dma.hbm_to_vmem [thread:$0]  (!%p457_p8), %s453_s21, 256, %s455_s23, %s85_s25  }
  0x24   : > { %p513_p0 = scmp.lt.s32.totalorder %s391_s9, 3  ;;  %p514_p1 = scmp.ge.s32.totalorder %s391_s9, 1 }
  0x26   : > { %p102_p12 = pnand %p514_p1, %p513_p0 }
  0x27   : > { %s107_s12 = sand.u32 (!%p102_p12), 1, %s383_s7   ;;  %p515_p9 = scmp.ne.s32.totalorder (!%p102_p12), %s511_s15, 0 }
  0x28   : > { %105 = sbr.rel (%p102_p12) target bundleno = 180 (0xb4), region = 24  ;;  %s279_s13 = sshll.u32 (!%p102_p12), %s107_s12, 4 }
  0x29   : > { %s108_s16 = scalar_lea.sflag (!%p102_p12), [#allocation3], %s107_s12  ;;  %s111_s17 = scalar_lea.vmem (!%p102_p12), [#allocation2], %s279_s13 }
  0x2d   : > { %374 = dma.done.wait (%p515_p9), %s108_s16, 256  }
  0x2e   : > { %376 = vsyncadd (%p515_p9), %s108_s16, 4294967040  ;;  %v135_v0 = vld [vmem:[%s111_s17] sm:$0x7e]  ;;  %v136_v1 = vld [vmem:[%s111_s17 + $0x8] sm:$0x7e]  ;;  %s394_s18 = smov 127   ;;  %v169_v6 = vlaneseq }
  0x2f   : > { %v161_v2 = vrot.slane %v135_v0, 1  ;;  %s395_s19 = smov 1   ;;  %v162_v3 = vrot.slane %v136_v1, 1  ;;  %s396_s9 = smov 16   ;;  %v139_v4 = vld [vmem:[%s111_s17] sm:$0xfc] }
  0x30   : > { %s397_s20 = smov 112   ;;  %v140_v5 = vld [vmem:[%s111_s17 + $0x8] sm:$0xfc]  ;;  %v143_v7 = vrot.slane %v139_v4, 2  ;;  %v150_v9 = vmul.f32 6.0, %v136_v1  ;;  %v149_v10 = vmul.f32 6.0, %v135_v0 }
  0x31   : > { %176 = vrot.lane.b32.xlu1 %v161_v2, %s394_s18  ;;  %165 = vrot.lane.b32.xlu0 %v161_v2, %s395_s19  ;;  %v144_v8 = vrot.slane %v140_v5, 2  ;;  %v137_v11 = vld [vmem:[%s111_s17] sm:$0x3f]  ;;  %v138_v12 = vld [vmem:[%s111_s17 + $0x8] sm:$0x3f]  ;;  %v170_v13 = vand.u32 127, %v169_v6 }
  0x32   : > { %v147_v14 = vadd.f32 %v143_v7, %v137_v11  ;;  %v154_v16 = vrot.slane %v150_v9, 1  ;;  %v153_v17 = vrot.slane %v149_v10, 1  ;;  %p130_p7 = scmp.lt.s32.totalorder %s427_s10, 1 }
  0x33   : > { %v148_v15 = vadd.f32 %v144_v8, %v138_v12  ;;  %vm171_vm0 = vcmp.lt.s32.totalorder %v170_v13, 1  ;;  %vm180_vm1 = vcmp.lt.s32.totalorder %v170_v13, 127  ;;  %vm189_vm2 = vcmp.lt.s32.totalorder %v170_v13, 16 }
  0x34   : > { %v157_v21 = vsub.f32 %v147_v14, %v153_v17  ;;  %s521_s10 = smov (!%p130_p7, %s427_s10), 1  ;;  %vm198_vm3 = vcmp.lt.s32.totalorder %v170_v13, 112 }
  0x35   : > { %178 = vrot.lane.b32.xlu1 %v162_v3, %s394_s18  ;;  %167 = vrot.lane.b32.xlu0 %v162_v3, %s395_s19  ;;  %v158_v20 = vsub.f32 %v148_v15, %v154_v16  ;;  %s285_s15 = sshll.u32 %s521_s10, 4 }
  0x36   : > { %s134_s23 = scalar_lea.vmem %s509_s1, %s285_s15 }
  0x39   : > { %187 = vrot.lane.b32.xlu1 %v162_v3, %s396_s9  ;;  %185 = vrot.lane.b32.xlu0 %v161_v2, %s396_s9 }
  0x3d   : > { %196 = vrot.lane.b32.xlu1 %v162_v3, %s397_s20  ;;  %194 = vrot.lane.b32.xlu0 %v161_v2, %s397_s20 }
  0xa3   : > { %v177_v18 = vpop.permute.xlu1 %176  ;;  %v166_v19 = vpop.permute.xlu0 %165 }
  0xa7   : > { %v179_v22 = vpop.permute.xlu1 %178  ;;  %v168_v23 = vpop.permute.xlu0 %167 }
  0xa8   : > { %v172_v24 = vsel %vm171_vm0, %v166_v19, %v168_v23  ;;  %v173_v25 = vsel %vm171_vm0, %v168_v23, %v166_v19  ;;  %v181_v28 = vsel %vm180_vm1, %v177_v18, %v179_v22  ;;  %v182_v29 = vsel %vm180_vm1, %v179_v22, %v177_v18 }
  0xa9   : > { %v174_v26 = vadd.f32 %v173_v25, %v157_v21  ;;  %v175_v27 = vadd.f32 %v172_v24, %v158_v20 }
  0xab   : > { %v188_v30 = vpop.permute.xlu1 %187  ;;  %v184_v31 = vadd.f32 %v182_v29, %v175_v27  ;;  %v186_v32 = vpop.permute.xlu0 %185  ;;  %v183_v33 = vadd.f32 %v181_v28, %v174_v26 }
  0xac   : > { %v190_v34 = vsel %vm189_vm2, %v186_v32, %v188_v30  ;;  %v191_v35 = vsel %vm189_vm2, %v188_v30, %v186_v32 }
  0xad   : > { %v192_v36 = vadd.f32 %v191_v35, %v183_v33  ;;  %v193_v37 = vadd.f32 %v190_v34, %v184_v31 }
  0xaf   : > { %v197_v38 = vpop.permute.xlu1 %196  ;;  %v195_v39 = vpop.permute.xlu0 %194 }
  0xb0   : > { %v199_v40 = vsel %vm198_vm3, %v195_v39, %v197_v38  ;;  %v200_v41 = vsel %vm198_vm3, %v197_v38, %v195_v39 }
  0xb1   : > { %v201_v42 = vadd.f32 %v199_v40, %v192_v36  ;;  %v202_v43 = vadd.f32 %v200_v41, %v193_v37 }
  0xb3   : > { %203 = vst [vmem:[%s134_s23] sm:$0x3f] %v201_v42  ;;  %204 = vst [vmem:[%s134_s23 + $0x8] sm:$0x3f] %v202_v43 }
  0xb4 PF: > { %p11_p8 = scmp.ge.s32.totalorder %s430_s11, 4   ;;  %s516_s6 = smov %s383_s7 }
  0xb5   : > { %s517_s7 = smov %s387_s8  ;;  %s518_s8 = smov %s440_s14 }
  0xb6   : > { %s519_s9 = smov %s430_s11  ;;  %13 = sbr.rel (!%p11_p8) target bundleno = 3 (0x3), region = 64 }
  0xbb   :  { %226 = vsyncpa [#allocation3], 1 }
  0xbc   :  { %228 = vsyncpa [#allocation3 + $0x1], 1 }

</bundles_post_ra>
